<compile_context>
chip_gen: v5e
topology: v5e:2x2
jax: 0.10.0
libtpu: 0.0.40
codegen_flags: <defaults>
</compile_context>

<pallas_src>
import math

import jax
import jax.numpy as jnp
from jax.experimental import pallas as pl
from jax.experimental.pallas import tpu as pltpu


def _choose_group(num_rows, row_width, target_lanes=128, max_group=32):
    """Fold G consecutive logical rows into one kernel row so G*row_width >= 128 lanes."""
    if row_width >= target_lanes or num_rows <= 1:
        return 1
    target = -(-target_lanes // row_width)
    best_below, best_above = 1, None
    d = 1
    while d * d <= num_rows:
        if num_rows % d == 0:
            for cand in (d, num_rows // d):
                if cand > max_group:
                    continue
                if cand >= target:
                    if best_above is None or cand < best_above:
                        best_above = cand
                else:
                    best_below = max(best_below, cand)
        d += 1
    return best_above if best_above is not None else best_below


def _choose_row_tile(rows, row_bytes, vmem_budget=8 << 20):
    """Largest row tile (divisor of rows, multiple of 8 when tiling) within a VMEM budget.

    Budget counts 2x double-buffered input + 2x output (4 live buffers), kept well
    under the 32 MiB scoped-VMEM limit so the same sizing is safe on v7x (64 MiB
    physical VMEM) as well as v5e/v6e (128 MiB).
    """
    cap = max(1, vmem_budget // (4 * max(1, row_bytes)))
    if rows <= cap:
        return rows  # whole-array block: always layout-legal, single burst DMA
    best = None
    for t in range(8, min(rows, cap) + 1, 8):
        if rows % t == 0:
            best = t
    if best is not None:
        return best
    for t in range(8, min(rows, 1 << 16) + 1, 8):
        if rows % t == 0:
            return t
    return rows


def _make_pad_middle_kernel(a, z, n_in, n_out, groups, has_ins):
    """Per kernel row: out = [x[:a] | ins_or_zeros(z) | x[a:]] repeated for `groups` folds."""
    suffix = n_in - a

    def kernel(*refs):
        if has_ins:
            x_ref, ins_ref, o_ref = refs
        else:
            x_ref, o_ref = refs
        rows = o_ref.shape[0]
        if z > 0 and not has_ins:
            zeros_blk = jnp.zeros((rows, z), dtype=o_ref.dtype)  # hoisted out of unrolled loop
        for g in range(groups):
            xo = g * n_in
            oo = g * n_out
            if a > 0:
                o_ref[:, oo:oo + a] = x_ref[:, xo:xo + a]
            if z > 0:
                if has_ins:
                    o_ref[:, oo + a:oo + a + z] = ins_ref[:, g * z:(g + 1) * z]
                else:
                    o_ref[:, oo + a:oo + a + z] = zeros_blk
            if suffix > 0:
                o_ref[:, oo + a + z:oo + n_out] = x_ref[:, xo + a:xo + n_in]

    return kernel


def _insert_middle(x, axis, split, pad, ins=None):
    """Insert `pad` slots (zeros, or the content of `ins`) at `split` along `axis`."""
    shape = tuple(x.shape)
    nd = len(shape)
    axis = axis % nd
    size_a = shape[axis]
    assert 0 <= split <= size_a, "split out of range"
    assert pad >= 0, "new_h must not shrink the axis"

    inner = int(math.prod(shape[axis + 1:]))
    outer = int(math.prod(shape[:axis]))
    n_in = size_a * inner
    n_out = (size_a + pad) * inner
    a = split * inner
    z = pad * inner
    out_full_shape = shape[:axis] + (size_a + pad,) + shape[axis + 1:]

    if outer == 0 or n_in == 0:
        return jnp.zeros(out_full_shape, x.dtype)

    itemsize = jnp.dtype(x.dtype).itemsize
    groups = _choose_group(outer, n_in)
    rows = outer // groups
    w_in, w_out, w_ins = groups * n_in, groups * n_out, groups * z

    tr = _choose_row_tile(rows, w_out * itemsize)
    grid = (rows // tr,)

    x2 = x.reshape(rows, w_in)
    args = [x2]
    in_specs = [pl.BlockSpec((tr, w_in), lambda i: (i, 0))]
    if ins is not None:
        ins2 = ins.astype(x.dtype).reshape(rows, w_ins)
        args.append(ins2)
        in_specs.append(pl.BlockSpec((tr, w_ins), lambda i: (i, 0)))
    out_spec = pl.BlockSpec((tr, w_out), lambda i: (i, 0))

    bytes_accessed = (rows * (w_in + w_out) + (rows * w_ins if ins is not None else 0)) * itemsize
    kernel = _make_pad_middle_kernel(a, z, n_in, n_out, groups, ins is not None)

    out2 = pl.pallas_call(
        kernel,
        out_shape=jax.ShapeDtypeStruct((rows, w_out), x.dtype),
        grid=grid,
        in_specs=in_specs,
        out_specs=out_spec,
        compiler_params=pltpu.CompilerParams(
            dimension_semantics=("parallel",),  # shards row tiles across v7x's 2 TensorCores
            vmem_limit_bytes=32 * 1024 * 1024,
        ),
        cost_estimate=pl.CostEstimate(
            flops=0, transcendentals=0, bytes_accessed=int(bytes_accessed)),
    )(*args)
    return out2.reshape(out_full_shape)


def upsample_layer(x, new_h, pos_embed=False):
    """JAX/Pallas equivalent of UpsampleLayer.forward."""
    x_orig = None
    if isinstance(x, tuple):
        x_orig = x
        x = x[0]
    shp = list(x.shape)

    if len(shp) == 6:
        h = shp[3] - 1
        return _insert_middle(x, axis=3, split=h, pad=new_h - h)

    if shp[-2] == shp[-1] or shp[-1] == 1:
        h = shp[2] - 1
        return _insert_middle(x, axis=2, split=h, pad=new_h - h)

    h = shp[-1]
    pad = new_h - h
    if not pos_embed:
        return _insert_middle(x, axis=-1, split=h - 1, pad=pad)

    assert pad >= 2, "pos_embed needs at least 2 inserted slots"
    if x_orig is not None:
        # TODO(synk): old-PyTorch integer floor-division vs true-division is ambiguous for
        # (x_orig[1] / dim_y); implemented with true division (modern torch semantics).
        idx = jnp.asarray(x_orig[1])
        dim_x, dim_y = x_orig[2], x_orig[3]
        y_coord = ((idx / dim_y)[..., None]).astype(jnp.float32) / dim_y
        x_coord = ((idx % 50)[..., None]).astype(jnp.float32) / dim_x
    else:
        dim_x, dim_y = shp[2], shp[3]
        x_coord = jnp.broadcast_to(
            (jnp.arange(dim_x, dtype=jnp.float32) / dim_x)[None, :], (dim_y, dim_x))
        y_coord = jnp.broadcast_to(
            (jnp.arange(dim_y, dtype=jnp.float32) / dim_y)[:, None], (dim_y, dim_x))
        x_coord = jnp.broadcast_to(x_coord[None, None], (shp[0], shp[1], dim_y, dim_x))[..., None]
        y_coord = jnp.broadcast_to(y_coord[None, None], (shp[0], shp[1], dim_y, dim_x))[..., None]
    zeros_tail = jnp.zeros(tuple(shp[:-1]) + (pad - 2,), dtype=x.dtype)
    ins = jnp.concatenate(
        [x_coord.astype(x.dtype), y_coord.astype(x.dtype), zeros_tail], axis=-1)
    return _insert_middle(x, axis=-1, split=h - 1, pad=pad, ins=ins)


class UpsampleLayer:
    def __init__(self, new_h, pos_embed=False):
        self.new_h = new_h
        self.pos_embed = pos_embed

    def __call__(self, x):
        return upsample_layer(x, self.new_h, self.pos_embed)


if __name__ == "__main__":
    key = jax.random.PRNGKey(0)
    k1, k2, k3 = jax.random.split(key, 3)

    # --- Branch 3: 5-D capsule tensor, zeros inserted inside the last (pose) dim.
    B, C, H, W, h = 2, 4, 6, 6, 16
    new_h = 20
    pad = new_h - h
    x = jax.random.normal(k1, (B, C, H, W, h), dtype=jnp.float32)
    out = jax.block_until_ready(upsample_layer(x, new_h, pos_embed=False))
    ref = jnp.concatenate(
        [x[..., :h - 1], jnp.zeros((B, C, H, W, pad), x.dtype), x[..., h - 1:]], axis=-1)
    assert out.shape == ref.shape and out.dtype == x.dtype
    assert bool(jnp.array_equal(out, ref)), "branch-3 (last-dim) mismatch"

    # --- Branch 3 with a tuple input (x_orig pass-through, pos_embed=False).
    out_t = jax.block_until_ready(upsample_layer((x, 0, H, W), new_h))
    assert bool(jnp.array_equal(out_t, ref)), "tuple pass-through mismatch"

    # --- Branch 3 with pos_embed=True (coordinate channels inside the inserted slab).
    out_pe = jax.block_until_ready(upsample_layer(x, new_h, pos_embed=True))
    dim_x, dim_y = H, W
    x_coord = jnp.broadcast_to(
        (jnp.arange(dim_x, dtype=jnp.float32) / dim_x)[None, :], (dim_y, dim_x))
    y_coord = jnp.broadcast_to(
        (jnp.arange(dim_y, dtype=jnp.float32) / dim_y)[:, None], (dim_y, dim_x))
    x_coord = jnp.broadcast_to(x_coord[None, None], (B, C, dim_y, dim_x))[..., None]
    y_coord = jnp.broadcast_to(y_coord[None, None], (B, C, dim_y, dim_x))[..., None]
    ins_ref = jnp.concatenate(
        [x_coord, y_coord, jnp.zeros((B, C, H, W, pad - 2), jnp.float32)], axis=-1)
    ref_pe = jnp.concatenate([x[..., :h - 1], ins_ref, x[..., h - 1:]], axis=-1)
    assert bool(jnp.allclose(out_pe, ref_pe)), "branch-3 pos_embed mismatch"

    # --- Branch 2: square trailing pose matrix -> zeros inserted along dim 2.
    new_h2 = 8
    x2 = jax.random.normal(k2, (2, 4, 6, 4, 4), dtype=jnp.float32)
    out2 = jax.block_until_ready(upsample_layer(x2, new_h2))
    h2 = x2.shape[2] - 1
    ref2 = jnp.concatenate(
        [x2[:, :, :h2], jnp.zeros((2, 4, new_h2 - h2, 4, 4), x2.dtype), x2[:, :, h2:]], axis=2)
    assert bool(jnp.array_equal(out2, ref2)), "branch-2 (dim-2) mismatch"

    # --- Branch 1: 6-D input -> zeros inserted along dim 3.
    new_h3 = 6
    x3 = jax.random.normal(k3, (2, 3, 2, 4, 4, 4), dtype=jnp.float32)
    out3 = jax.block_until_ready(upsample_layer(x3, new_h3))
    h3 = x3.shape[3] - 1
    ref3 = jnp.concatenate(
        [x3[:, :, :, :h3], jnp.zeros((2, 3, 2, new_h3 - h3, 4, 4), x3.dtype), x3[:, :, :, h3:]],
        axis=3)
    assert bool(jnp.array_equal(out3, ref3)), "branch-1 (6-D) mismatch"

    print("KERNEL_OK")
</pallas_src>

<mosaic_0001>
module attributes {stable_mosaic.version = 11 : i64} {
  func.func @kernel(%arg0: i32, %arg1: memref<36x128xf32, #tpu.memory_space<vmem>>, %arg2: memref<36x160xf32, #tpu.memory_space<vmem>>) attributes {dimension_semantics = [#tpu.dimension_semantics<parallel>], iteration_bounds = array<i64: 1>, scalar_prefetch = 0 : i64, scratch_operands = 0 : i64, tpu.core_type = #tpu.core_type<tc>, window_params = [{transform_indices = @transform_0, window_bounds = array<i64: 36, 128>}, {transform_indices = @transform_1, window_bounds = array<i64: 36, 160>}]} {
    %cst = arith.constant 0.000000e+00 : f32
    %0 = vector.broadcast %cst : f32 to vector<36x4xf32>
    %c0 = arith.constant 0 : index
    %c0_0 = arith.constant 0 : index
    %1 = vector.load %arg1[%c0, %c0_0] : memref<36x128xf32, #tpu.memory_space<vmem>>, vector<36x15xf32>
    %c0_1 = arith.constant 0 : index
    %c0_2 = arith.constant 0 : index
    %2 = vector.load %arg2[%c0_1, %c0_2] : memref<36x160xf32, #tpu.memory_space<vmem>>, vector<36x15xf32>
    tpu.vector_store %arg2[%c0_1, %c0_2], %1 {strides = array<i32>} : memref<36x160xf32, #tpu.memory_space<vmem>>, vector<36x15xf32>,
    %c0_3 = arith.constant 0 : index
    %c15 = arith.constant 15 : index
    %3 = vector.load %arg2[%c0_3, %c15] : memref<36x160xf32, #tpu.memory_space<vmem>>, vector<36x4xf32>
    tpu.vector_store %arg2[%c0_3, %c15], %0 {strides = array<i32>} : memref<36x160xf32, #tpu.memory_space<vmem>>, vector<36x4xf32>,
    %c0_4 = arith.constant 0 : index
    %c15_5 = arith.constant 15 : index
    %4 = vector.load %arg1[%c0_4, %c15_5] : memref<36x128xf32, #tpu.memory_space<vmem>>, vector<36x1xf32>
    %c0_6 = arith.constant 0 : index
    %c19 = arith.constant 19 : index
    %5 = vector.load %arg2[%c0_6, %c19] : memref<36x160xf32, #tpu.memory_space<vmem>>, vector<36x1xf32>
    tpu.vector_store %arg2[%c0_6, %c19], %4 {strides = array<i32>} : memref<36x160xf32, #tpu.memory_space<vmem>>, vector<36x1xf32>,
    %c0_7 = arith.constant 0 : index
    %c16 = arith.constant 16 : index
    %6 = vector.load %arg1[%c0_7, %c16] : memref<36x128xf32, #tpu.memory_space<vmem>>, vector<36x15xf32>
    %c0_8 = arith.constant 0 : index
    %c20 = arith.constant 20 : index
    %7 = vector.load %arg2[%c0_8, %c20] : memref<36x160xf32, #tpu.memory_space<vmem>>, vector<36x15xf32>
    tpu.vector_store %arg2[%c0_8, %c20], %6 {strides = array<i32>} : memref<36x160xf32, #tpu.memory_space<vmem>>, vector<36x15xf32>,
    %c0_9 = arith.constant 0 : index
    %c35 = arith.constant 35 : index
    %8 = vector.load %arg2[%c0_9, %c35] : memref<36x160xf32, #tpu.memory_space<vmem>>, vector<36x4xf32>
    tpu.vector_store %arg2[%c0_9, %c35], %0 {strides = array<i32>} : memref<36x160xf32, #tpu.memory_space<vmem>>, vector<36x4xf32>,
    %c0_10 = arith.constant 0 : index
    %c31 = arith.constant 31 : index
    %9 = vector.load %arg1[%c0_10, %c31] : memref<36x128xf32, #tpu.memory_space<vmem>>, vector<36x1xf32>
    %c0_11 = arith.constant 0 : index
    %c39 = arith.constant 39 : index
    %10 = vector.load %arg2[%c0_11, %c39] : memref<36x160xf32, #tpu.memory_space<vmem>>, vector<36x1xf32>
    tpu.vector_store %arg2[%c0_11, %c39], %9 {strides = array<i32>} : memref<36x160xf32, #tpu.memory_space<vmem>>, vector<36x1xf32>,
    %c0_12 = arith.constant 0 : index
    %c32 = arith.constant 32 : index
    %11 = vector.load %arg1[%c0_12, %c32] : memref<36x128xf32, #tpu.memory_space<vmem>>, vector<36x15xf32>
    %c0_13 = arith.constant 0 : index
    %c40 = arith.constant 40 : index
    %12 = vector.load %arg2[%c0_13, %c40] : memref<36x160xf32, #tpu.memory_space<vmem>>, vector<36x15xf32>
    tpu.vector_store %arg2[%c0_13, %c40], %11 {strides = array<i32>} : memref<36x160xf32, #tpu.memory_space<vmem>>, vector<36x15xf32>,
    %c0_14 = arith.constant 0 : index
    %c55 = arith.constant 55 : index
    %13 = vector.load %arg2[%c0_14, %c55] : memref<36x160xf32, #tpu.memory_space<vmem>>, vector<36x4xf32>
    tpu.vector_store %arg2[%c0_14, %c55], %0 {strides = array<i32>} : memref<36x160xf32, #tpu.memory_space<vmem>>, vector<36x4xf32>,
    %c0_15 = arith.constant 0 : index
    %c47 = arith.constant 47 : index
    %14 = vector.load %arg1[%c0_15, %c47] : memref<36x128xf32, #tpu.memory_space<vmem>>, vector<36x1xf32>
    %c0_16 = arith.constant 0 : index
    %c59 = arith.constant 59 : index
    %15 = vector.load %arg2[%c0_16, %c59] : memref<36x160xf32, #tpu.memory_space<vmem>>, vector<36x1xf32>
    tpu.vector_store %arg2[%c0_16, %c59], %14 {strides = array<i32>} : memref<36x160xf32, #tpu.memory_space<vmem>>, vector<36x1xf32>,
    %c0_17 = arith.constant 0 : index
    %c48 = arith.constant 48 : index
    %16 = vector.load %arg1[%c0_17, %c48] : memref<36x128xf32, #tpu.memory_space<vmem>>, vector<36x15xf32>
    %c0_18 = arith.constant 0 : index
    %c60 = arith.constant 60 : index
    %17 = vector.load %arg2[%c0_18, %c60] : memref<36x160xf32, #tpu.memory_space<vmem>>, vector<36x15xf32>
    tpu.vector_store %arg2[%c0_18, %c60], %16 {strides = array<i32>} : memref<36x160xf32, #tpu.memory_space<vmem>>, vector<36x15xf32>,
    %c0_19 = arith.constant 0 : index
    %c75 = arith.constant 75 : index
    %18 = vector.load %arg2[%c0_19, %c75] : memref<36x160xf32, #tpu.memory_space<vmem>>, vector<36x4xf32>
    tpu.vector_store %arg2[%c0_19, %c75], %0 {strides = array<i32>} : memref<36x160xf32, #tpu.memory_space<vmem>>, vector<36x4xf32>,
    %c0_20 = arith.constant 0 : index
    %c63 = arith.constant 63 : index
    %19 = vector.load %arg1[%c0_20, %c63] : memref<36x128xf32, #tpu.memory_space<vmem>>, vector<36x1xf32>
    %c0_21 = arith.constant 0 : index
    %c79 = arith.constant 79 : index
    %20 = vector.load %arg2[%c0_21, %c79] : memref<36x160xf32, #tpu.memory_space<vmem>>, vector<36x1xf32>
    tpu.vector_store %arg2[%c0_21, %c79], %19 {strides = array<i32>} : memref<36x160xf32, #tpu.memory_space<vmem>>, vector<36x1xf32>,
    %c0_22 = arith.constant 0 : index
    %c64 = arith.constant 64 : index
    %21 = vector.load %arg1[%c0_22, %c64] : memref<36x128xf32, #tpu.memory_space<vmem>>, vector<36x15xf32>
    %c0_23 = arith.constant 0 : index
    %c80 = arith.constant 80 : index
    %22 = vector.load %arg2[%c0_23, %c80] : memref<36x160xf32, #tpu.memory_space<vmem>>, vector<36x15xf32>
    tpu.vector_store %arg2[%c0_23, %c80], %21 {strides = array<i32>} : memref<36x160xf32, #tpu.memory_space<vmem>>, vector<36x15xf32>,
    %c0_24 = arith.constant 0 : index
    %c95 = arith.constant 95 : index
    %23 = vector.load %arg2[%c0_24, %c95] : memref<36x160xf32, #tpu.memory_space<vmem>>, vector<36x4xf32>
    tpu.vector_store %arg2[%c0_24, %c95], %0 {strides = array<i32>} : memref<36x160xf32, #tpu.memory_space<vmem>>, vector<36x4xf32>,
    %c0_25 = arith.constant 0 : index
    %c79_26 = arith.constant 79 : index
    %24 = vector.load %arg1[%c0_25, %c79_26] : memref<36x128xf32, #tpu.memory_space<vmem>>, vector<36x1xf32>
    %c0_27 = arith.constant 0 : index
    %c99 = arith.constant 99 : index
    %25 = vector.load %arg2[%c0_27, %c99] : memref<36x160xf32, #tpu.memory_space<vmem>>, vector<36x1xf32>
    tpu.vector_store %arg2[%c0_27, %c99], %24 {strides = array<i32>} : memref<36x160xf32, #tpu.memory_space<vmem>>, vector<36x1xf32>,
    %c0_28 = arith.constant 0 : index
    %c80_29 = arith.constant 80 : index
    %26 = vector.load %arg1[%c0_28, %c80_29] : memref<36x128xf32, #tpu.memory_space<vmem>>, vector<36x15xf32>
    %c0_30 = arith.constant 0 : index
    %c100 = arith.constant 100 : index
    %27 = vector.load %arg2[%c0_30, %c100] : memref<36x160xf32, #tpu.memory_space<vmem>>, vector<36x15xf32>
    tpu.vector_store %arg2[%c0_30, %c100], %26 {strides = array<i32>} : memref<36x160xf32, #tpu.memory_space<vmem>>, vector<36x15xf32>,
    %c0_31 = arith.constant 0 : index
    %c115 = arith.constant 115 : index
    %28 = vector.load %arg2[%c0_31, %c115] : memref<36x160xf32, #tpu.memory_space<vmem>>, vector<36x4xf32>
    tpu.vector_store %arg2[%c0_31, %c115], %0 {strides = array<i32>} : memref<36x160xf32, #tpu.memory_space<vmem>>, vector<36x4xf32>,
    %c0_32 = arith.constant 0 : index
    %c95_33 = arith.constant 95 : index
    %29 = vector.load %arg1[%c0_32, %c95_33] : memref<36x128xf32, #tpu.memory_space<vmem>>, vector<36x1xf32>
    %c0_34 = arith.constant 0 : index
    %c119 = arith.constant 119 : index
    %30 = vector.load %arg2[%c0_34, %c119] : memref<36x160xf32, #tpu.memory_space<vmem>>, vector<36x1xf32>
    tpu.vector_store %arg2[%c0_34, %c119], %29 {strides = array<i32>} : memref<36x160xf32, #tpu.memory_space<vmem>>, vector<36x1xf32>,
    %c0_35 = arith.constant 0 : index
    %c96 = arith.constant 96 : index
    %31 = vector.load %arg1[%c0_35, %c96] : memref<36x128xf32, #tpu.memory_space<vmem>>, vector<36x15xf32>
    %c0_36 = arith.constant 0 : index
    %c120 = arith.constant 120 : index
    %32 = vector.load %arg2[%c0_36, %c120] : memref<36x160xf32, #tpu.memory_space<vmem>>, vector<36x15xf32>
    tpu.vector_store %arg2[%c0_36, %c120], %31 {strides = array<i32>} : memref<36x160xf32, #tpu.memory_space<vmem>>, vector<36x15xf32>,
    %c0_37 = arith.constant 0 : index
    %c135 = arith.constant 135 : index
    %33 = vector.load %arg2[%c0_37, %c135] : memref<36x160xf32, #tpu.memory_space<vmem>>, vector<36x4xf32>
    tpu.vector_store %arg2[%c0_37, %c135], %0 {strides = array<i32>} : memref<36x160xf32, #tpu.memory_space<vmem>>, vector<36x4xf32>,
    %c0_38 = arith.constant 0 : index
    %c111 = arith.constant 111 : index
    %34 = vector.load %arg1[%c0_38, %c111] : memref<36x128xf32, #tpu.memory_space<vmem>>, vector<36x1xf32>
    %c0_39 = arith.constant 0 : index
    %c139 = arith.constant 139 : index
    %35 = vector.load %arg2[%c0_39, %c139] : memref<36x160xf32, #tpu.memory_space<vmem>>, vector<36x1xf32>
    tpu.vector_store %arg2[%c0_39, %c139], %34 {strides = array<i32>} : memref<36x160xf32, #tpu.memory_space<vmem>>, vector<36x1xf32>,
    %c0_40 = arith.constant 0 : index
    %c112 = arith.constant 112 : index
    %36 = vector.load %arg1[%c0_40, %c112] : memref<36x128xf32, #tpu.memory_space<vmem>>, vector<36x15xf32>
    %c0_41 = arith.constant 0 : index
    %c140 = arith.constant 140 : index
    %37 = vector.load %arg2[%c0_41, %c140] : memref<36x160xf32, #tpu.memory_space<vmem>>, vector<36x15xf32>
    tpu.vector_store %arg2[%c0_41, %c140], %36 {strides = array<i32>} : memref<36x160xf32, #tpu.memory_space<vmem>>, vector<36x15xf32>,
    %c0_42 = arith.constant 0 : index
    %c155 = arith.constant 155 : index
    %38 = vector.load %arg2[%c0_42, %c155] : memref<36x160xf32, #tpu.memory_space<vmem>>, vector<36x4xf32>
    tpu.vector_store %arg2[%c0_42, %c155], %0 {strides = array<i32>} : memref<36x160xf32, #tpu.memory_space<vmem>>, vector<36x4xf32>,
    %c0_43 = arith.constant 0 : index
    %c127 = arith.constant 127 : index
    %39 = vector.load %arg1[%c0_43, %c127] : memref<36x128xf32, #tpu.memory_space<vmem>>, vector<36x1xf32>
    %c0_44 = arith.constant 0 : index
    %c159 = arith.constant 159 : index
    %40 = vector.load %arg2[%c0_44, %c159] : memref<36x160xf32, #tpu.memory_space<vmem>>, vector<36x1xf32>
    tpu.vector_store %arg2[%c0_44, %c159], %39 {strides = array<i32>} : memref<36x160xf32, #tpu.memory_space<vmem>>, vector<36x1xf32>,
    return
  }
  func.func @transform_0(%arg0: i32) -> (i32, i32) {
    %c0_i32 = arith.constant 0 : i32
    %c0_i32_0 = arith.constant 0 : i32
    return %arg0, %c0_i32 : i32, i32
  }
  func.func @transform_1(%arg0: i32) -> (i32, i32) {
    %c0_i32 = arith.constant 0 : i32
    %c0_i32_0 = arith.constant 0 : i32
    return %arg0, %c0_i32 : i32, i32
  }
}

</mosaic_0001>

<bundles_post_ra>
// kernel: tpu_custom_call.1
= control target key start
LH: loop header
LB: loop body
LE: loop exit
PB: predicated region body
PF: predicated region fallthrough
CT: control target
= control target key end

     0   :  { %6 = vsyncpa [#allocation3], 0  ;;  %s949_s0 = inlined_call_operand.hbm [shape: f32[36,128], index: 0, kind: input, shape index: {}]   ;;  %s950_s1 = inlined_call_operand.hbm [shape: f32[36,160], index: 1, kind: output, shape index: {}]  }
   0x1   :  { %7 = vsyncpa [#allocation4], 0  ;;  %s12_s8 = sshll.u32 %s949_s0, 4  ;;  %s664_s9 = smov [#allocation2]   ;;  %s13_s8 = int_to_ptr.hbm [resolvable:$true] %s12_s8 }
   0x2   :  { %s14_s10 = sshll.u32 %s664_s9, 4  ;;  %s665_s11 = smov 128   ;;  %s15_s10 = int_to_ptr.vmem [resolvable:$true] %s14_s10 }
   0x3   :  { %s666_s12 = smov 8  }
   0x4   :  { %20 = dma.hbm_to_vmem [thread:$0]  %s13_s8, 640, %s15_s10, [#allocation3], %s665_s11, %s665_s11, %s666_s12  }
   0x5   :  { %660 = dma.done.wait [#allocation3], 640  }
   0x6   :  { %661 = vsyncadd [#allocation3], 4294966656  ;;  %v691_v0 = vld [vmem:[#allocation2 + $0x10] sm:$0xff]  ;;  %v693_v1 = vld [vmem:[#allocation2] sm:$0xff]  ;;  %s667_s13 = smov 4   ;;  %s668_s0 = smov 12  }
   0x7   :  { %58 = vrot.lane.b32.xlu1 %v691_v0, %s667_s13  ;;  %54 = vrot.lane.b32.xlu0 %v693_v1, %s667_s13  ;;  %v48_v2 = vld [vmem:[#allocation2 + $0x20] sm:$0xf]  ;;  %v697_v3 = vld [vmem:[#allocation2 + $0x18] sm:$0xff]  ;;  %v699_v4 = vld [vmem:[#allocation2 + $0x8] sm:$0xff]  ;;  %s669_s14 = smov 16   ;;  %vm35_vm0 = vcmask 117760  }
   0x8   :  { %62 = vrot.lane.b32.xlu2 %v48_v2, %s667_s13  ;;  %v80_v5 = vld [vmem:[#allocation2 + $0x20] sm:$0xf]  ;;  %vm42_vm1 = vcmask 150648   ;;  %vm30_vm2 = vcmask 121856   ;;  %vm37_vm3 = vcmask 154744   ;;  %v670_v11 = vmov 0.0  }
   0x9   :  { %v119_v6 = vld [vmem:[#allocation2 + $0x20] sm:$0xf]  ;;  %33 = vst.msk [vmem:[#allocation5 + $0x20] sm:$0xff] %vm30_vm2, %v691_v0  ;;  %vm74_vm4 = vcmask 158872   ;;  %s671_s15 = smov 20   ;;  %vm69_vm5 = vcmask 162968  }
   0xa   :  { %v151_v7 = vld [vmem:[#allocation2 + $0x20] sm:$0xf]  ;;  %40 = vst.msk [vmem:[#allocation5 + $0x20] sm:$0xff] %vm37_vm3, %v670_v11  ;;  %vm101_vm6 = vcmask 285856   ;;  %vm108_vm7 = vcmask 318744   ;;  %s672_s16 = smov 24  }
   0xb   :  { %v190_v8 = vld [vmem:[#allocation2 + $0x20] sm:$0xf]  ;;  %31 = vst.msk [vmem:[#allocation5] sm:$0xff] %vm30_vm2, %v693_v1  ;;  %vm140_vm8 = vcmask 326968   ;;  %vm106_vm9 = vcmask 281760   ;;  %vm113_vm10 = vcmask 314648  }
   0xc   :  { %v222_v9 = vld [vmem:[#allocation2 + $0x20] sm:$0xf]  ;;  %38 = vst.msk [vmem:[#allocation5] sm:$0xff] %vm37_vm3, %v670_v11  ;;  %vm145_vm11 = vcmask 322872   ;;  %vm172_vm12 = vcmask 449856   ;;  %vm179_vm13 = vcmask 482744  }
   0xd   :  { %v29_v10 = vld [vmem:[#allocation2 + $0x20] sm:$0xf]  ;;  %34 = vst.msk [vmem:[#allocation5 + $0x30] sm:$0xff] %vm30_vm2, %v697_v3  ;;  %vm211_vm14 = vcmask 490968   ;;  %s673_s17 = smov 28   ;;  %vm177_vm15 = vcmask 445760  }
   0xe   :  { %36 = vst.msk [vmem:[#allocation5 + $0x40] sm:$0xf] %vm35_vm0, %v29_v10  ;;  %v261_v12 = vld [vmem:[#allocation2 + $0x20] sm:$0xf]  ;;  %vm184_vm0 = vcmask 478648   ;;  %s674_s18 = smov 32  }
   0xf   :  { %60 = vrot.lane.b32.xlu1 %v697_v3, %s667_s13  ;;  %56 = vrot.lane.b32.xlu0 %v699_v4, %s667_s13  ;;  %43 = vst.msk [vmem:[#allocation5 + $0x40] sm:$0xf] %vm42_vm1, %v670_v11  ;;  %v293_v15 = vld [vmem:[#allocation2 + $0x20] sm:$0xf]  ;;  %vm243_vm1 = vcmask 613856   ;;  %s586_s21 = sshll.u32 %s950_s1, 4  ;;  %s587_s21 = int_to_ptr.hbm [resolvable:$true] %s586_s21 }
  0x10   :  { %86 = vrot.lane.b32.xlu2 %v693_v1, %s667_s13  ;;  %41 = vst.msk [vmem:[#allocation5 + $0x30] sm:$0xff] %vm37_vm3, %v670_v11  ;;  %v332_v17 = vld [vmem:[#allocation2 + $0x20] sm:$0xf]  ;;  %s675_s22 = smov [#allocation5]   ;;  %s676_s24 = smov 256  }
  0x11   :  { %32 = vst.msk [vmem:[#allocation5 + $0x10] sm:$0xff] %vm30_vm2, %v699_v4  ;;  %v364_v24 = vld [vmem:[#allocation2 + $0x20] sm:$0xf]  ;;  %vm250_vm2 = vcmask 646744   ;;  %s584_s23 = sshll.u32 %s675_s22, 4  ;;  %s585_s23 = int_to_ptr.vmem [resolvable:$true] %s584_s23 }
  0x12   :  { %39 = vst.msk [vmem:[#allocation5 + $0x10] sm:$0xff] %vm37_vm3, %v670_v11  ;;  %v403_v31 = vld [vmem:[#allocation2 + $0x20] sm:$0xf]  ;;  %vm216_vm3 = vcmask 486872  }
  0x13   :  { %v435_v35 = vld [vmem:[#allocation2 + $0x20] sm:$0xf] }
  0x14   :  { %v481_v42 = vld [vmem:[#allocation2 + $0x20] sm:$0xf] }
  0x15   :  { %v513_v49 = vld [vmem:[#allocation2 + $0x20] sm:$0xf] }
  0x16   :  { %v552_v53 = vld [vmem:[#allocation2 + $0x20] sm:$0xf] }
  0x17   :  { %90 = vrot.lane.b32.xlu1 %v691_v0, %s667_s13  ;;  %88 = vrot.lane.b32.xlu0 %v699_v4, %s667_s13 }
  0x18   :  { %92 = vrot.lane.b32.xlu2 %v697_v3, %s667_s13 }
  0x1f   :  { %125 = vrot.lane.b32.xlu1 %v693_v1, %s666_s12  ;;  %94 = vrot.lane.b32.xlu0 %v80_v5, %s667_s13 }
  0x20   :  { %127 = vrot.lane.b32.xlu2 %v699_v4, %s666_s12 }
  0x27   :  { %131 = vrot.lane.b32.xlu1 %v697_v3, %s666_s12  ;;  %129 = vrot.lane.b32.xlu0 %v691_v0, %s666_s12 }
  0x28   :  { %133 = vrot.lane.b32.xlu2 %v119_v6, %s666_s12 }
  0x2f   :  { %159 = vrot.lane.b32.xlu1 %v699_v4, %s666_s12  ;;  %157 = vrot.lane.b32.xlu0 %v693_v1, %s666_s12 }
  0x30   :  { %161 = vrot.lane.b32.xlu2 %v691_v0, %s666_s12 }
  0x37   :  { %165 = vrot.lane.b32.xlu1 %v151_v7, %s666_s12  ;;  %163 = vrot.lane.b32.xlu0 %v697_v3, %s666_s12 }
  0x38   :  { %196 = vrot.lane.b32.xlu2 %v693_v1, %s668_s0 }
  0x3f   :  { %200 = vrot.lane.b32.xlu1 %v691_v0, %s668_s0  ;;  %198 = vrot.lane.b32.xlu0 %v699_v4, %s668_s0 }
  0x40   :  { %202 = vrot.lane.b32.xlu2 %v697_v3, %s668_s0 }
  0x47   :  { %228 = vrot.lane.b32.xlu1 %v693_v1, %s668_s0  ;;  %204 = vrot.lane.b32.xlu0 %v190_v8, %s668_s0 }
  0x48   :  { %230 = vrot.lane.b32.xlu2 %v699_v4, %s668_s0 }
  0x4f   :  { %234 = vrot.lane.b32.xlu1 %v697_v3, %s668_s0  ;;  %232 = vrot.lane.b32.xlu0 %v691_v0, %s668_s0 }
  0x50   :  { %236 = vrot.lane.b32.xlu2 %v222_v9, %s668_s0 }
  0x57   :  { %269 = vrot.lane.b32.xlu1 %v699_v4, %s669_s14  ;;  %267 = vrot.lane.b32.xlu0 %v693_v1, %s669_s14 }
  0x58   :  { %271 = vrot.lane.b32.xlu2 %v691_v0, %s669_s14 }
  0x5f   :  { %275 = vrot.lane.b32.xlu1 %v261_v12, %s669_s14  ;;  %273 = vrot.lane.b32.xlu0 %v697_v3, %s669_s14 }
  0x60   :  { %299 = vrot.lane.b32.xlu2 %v693_v1, %s669_s14 }
  0x62   :  { %v63_v13 = vpop.permute.xlu2 %62 }
  0x63   :  { %75 = vst.msk [vmem:[#allocation5 + $0x40] sm:$0xf] %vm74_vm4, %v63_v13  ;;  %vm248_vm4 = vcmask 609760  }
  0x67   :  { %303 = vrot.lane.b32.xlu1 %v691_v0, %s669_s14  ;;  %301 = vrot.lane.b32.xlu0 %v699_v4, %s669_s14 }
  0x68   :  { %305 = vrot.lane.b32.xlu2 %v697_v3, %s669_s14 }
  0x6a   :  { %v87_v14 = vpop.permute.xlu2 %86 }
  0x6f   :  { %338 = vrot.lane.b32.xlu1 %v693_v1, %s671_s15  ;;  %307 = vrot.lane.b32.xlu0 %v293_v15, %s669_s14 }
  0x70   :  { %340 = vrot.lane.b32.xlu2 %v699_v4, %s671_s15 }
  0x72   :  { %v93_v16 = vpop.permute.xlu2 %92 }
  0x77   :  { %344 = vrot.lane.b32.xlu1 %v697_v3, %s671_s15  ;;  %342 = vrot.lane.b32.xlu0 %v691_v0, %s671_s15 }
  0x78   :  { %346 = vrot.lane.b32.xlu2 %v332_v17, %s671_s15 }
  0x79   :  { %v59_v18 = vpop.permute.xlu1 %58  ;;  %v55_v19 = vpop.permute.xlu0 %54 }
  0x7a   :  { %72 = vst.msk [vmem:[#allocation5 + $0x20] sm:$0xff] %vm69_vm5, %v59_v18  ;;  %v128_v20 = vpop.permute.xlu2 %127 }
  0x7b   :  { %70 = vst.msk [vmem:[#allocation5] sm:$0xff] %vm69_vm5, %v55_v19 }
  0x7c   :  { %102 = vst.msk [vmem:[#allocation5] sm:$0xff] %vm101_vm6, %v87_v14 }
  0x7d   :  { %109 = vst.msk [vmem:[#allocation5] sm:$0xff] %vm108_vm7, %v670_v11 }
  0x7f   :  { %372 = vrot.lane.b32.xlu1 %v699_v4, %s671_s15  ;;  %370 = vrot.lane.b32.xlu0 %v693_v1, %s671_s15 }
  0x80   :  { %374 = vrot.lane.b32.xlu2 %v691_v0, %s671_s15 }
  0x81   :  { %v61_v21 = vpop.permute.xlu1 %60  ;;  %v57_v22 = vpop.permute.xlu0 %56 }
  0x82   :  { %73 = vst.msk [vmem:[#allocation5 + $0x30] sm:$0xff] %vm69_vm5, %v61_v21  ;;  %v134_v23 = vpop.permute.xlu2 %133 }
  0x83   :  { %71 = vst.msk [vmem:[#allocation5 + $0x10] sm:$0xff] %vm69_vm5, %v57_v22  ;;  %vm255_vm5 = vcmask 642648  }
  0x84   :  { %105 = vst.msk [vmem:[#allocation5 + $0x30] sm:$0xff] %vm101_vm6, %v93_v16 }
  0x85   :  { %112 = vst.msk [vmem:[#allocation5 + $0x30] sm:$0xff] %vm108_vm7, %v670_v11 }
  0x87   :  { %378 = vrot.lane.b32.xlu1 %v364_v24, %s671_s15  ;;  %376 = vrot.lane.b32.xlu0 %v697_v3, %s671_s15 }
  0x88   :  { %409 = vrot.lane.b32.xlu2 %v693_v1, %s672_s16 }
  0x89   :  { %v91_v25 = vpop.permute.xlu1 %90  ;;  %v89_v26 = vpop.permute.xlu0 %88 }
  0x8a   :  { %104 = vst.msk [vmem:[#allocation5 + $0x20] sm:$0xff] %vm101_vm6, %v91_v25  ;;  %v162_v27 = vpop.permute.xlu2 %161 }
  0x8b   :  { %103 = vst.msk [vmem:[#allocation5 + $0x10] sm:$0xff] %vm101_vm6, %v89_v26  ;;  %vm282_vm6 = vcmask 654968  }
  0x8c   :  { %110 = vst.msk [vmem:[#allocation5 + $0x10] sm:$0xff] %vm108_vm7, %v670_v11 }
  0x8d   :  { %142 = vst.msk [vmem:[#allocation5 + $0x10] sm:$0xff] %vm140_vm8, %v128_v20 }
  0x8e   :  { %111 = vst.msk [vmem:[#allocation5 + $0x20] sm:$0xff] %vm108_vm7, %v670_v11  ;;  %vm314_vm7 = vcmask 777856  }
  0x8f   :  { %413 = vrot.lane.b32.xlu1 %v691_v0, %s672_s16  ;;  %411 = vrot.lane.b32.xlu0 %v699_v4, %s672_s16 }
  0x90   :  { %415 = vrot.lane.b32.xlu2 %v697_v3, %s672_s16 }
  0x91   :  { %v126_v28 = vpop.permute.xlu1 %125  ;;  %v95_v29 = vpop.permute.xlu0 %94 }
  0x92   :  { %141 = vst.msk [vmem:[#allocation5] sm:$0xff] %vm140_vm8, %v126_v28  ;;  %v197_v30 = vpop.permute.xlu2 %196 }
  0x93   :  { %107 = vst.msk [vmem:[#allocation5 + $0x40] sm:$0xf] %vm106_vm9, %v95_v29  ;;  %vm287_vm9 = vcmask 650872  }
  0x94   :  { %114 = vst.msk [vmem:[#allocation5 + $0x40] sm:$0xf] %vm113_vm10, %v670_v11  ;;  %vm353_vm10 = vcmask 818968  }
  0x95   :  { %146 = vst.msk [vmem:[#allocation5 + $0x40] sm:$0xf] %vm145_vm11, %v134_v23  ;;  %vm319_vm11 = vcmask 773760  }
  0x97   :  { %441 = vrot.lane.b32.xlu1 %v693_v1, %s672_s16  ;;  %417 = vrot.lane.b32.xlu0 %v403_v31, %s672_s16 }
  0x98   :  { %443 = vrot.lane.b32.xlu2 %v699_v4, %s672_s16 }
  0x99   :  { %v132_v32 = vpop.permute.xlu1 %131  ;;  %v130_v33 = vpop.permute.xlu0 %129 }
  0x9a   :  { %144 = vst.msk [vmem:[#allocation5 + $0x30] sm:$0xff] %vm140_vm8, %v132_v32  ;;  %v203_v34 = vpop.permute.xlu2 %202 }
  0x9b   :  { %143 = vst.msk [vmem:[#allocation5 + $0x20] sm:$0xff] %vm140_vm8, %v130_v33  ;;  %vm321_vm8 = vcmask 810744  }
  0x9c   :  { %175 = vst.msk [vmem:[#allocation5 + $0x20] sm:$0xff] %vm172_vm12, %v162_v27 }
  0x9d   :  { %182 = vst.msk [vmem:[#allocation5 + $0x20] sm:$0xff] %vm179_vm13, %v670_v11 }
  0x9f   :  { %447 = vrot.lane.b32.xlu1 %v697_v3, %s672_s16  ;;  %445 = vrot.lane.b32.xlu0 %v691_v0, %s672_s16 }
  0xa0   :  { %449 = vrot.lane.b32.xlu2 %v435_v35, %s672_s16 }
  0xa1   :  { %v160_v36 = vpop.permute.xlu1 %159  ;;  %v158_v37 = vpop.permute.xlu0 %157 }
  0xa2   :  { %174 = vst.msk [vmem:[#allocation5 + $0x10] sm:$0xff] %vm172_vm12, %v160_v36  ;;  %v231_v38 = vpop.permute.xlu2 %230 }
  0xa3   :  { %173 = vst.msk [vmem:[#allocation5] sm:$0xff] %vm172_vm12, %v158_v37 }
  0xa4   :  { %180 = vst.msk [vmem:[#allocation5] sm:$0xff] %vm179_vm13, %v670_v11 }
  0xa5   :  { %212 = vst.msk [vmem:[#allocation5] sm:$0xff] %vm211_vm14, %v197_v30 }
  0xa6   :  { %181 = vst.msk [vmem:[#allocation5 + $0x10] sm:$0xff] %vm179_vm13, %v670_v11 }
  0xa7   :  { %489 = vrot.lane.b32.xlu1 %v699_v4, %s673_s17  ;;  %487 = vrot.lane.b32.xlu0 %v693_v1, %s673_s17 }
  0xa8   :  { %491 = vrot.lane.b32.xlu2 %v691_v0, %s673_s17 }
  0xa9   :  { %v166_v39 = vpop.permute.xlu1 %165  ;;  %v164_v40 = vpop.permute.xlu0 %163 }
  0xaa   :  { %178 = vst.msk [vmem:[#allocation5 + $0x40] sm:$0xf] %vm177_vm15, %v166_v39  ;;  %v237_v41 = vpop.permute.xlu2 %236  ;;  %vm392_vm15 = vcmask 974744  }
  0xab   :  { %176 = vst.msk [vmem:[#allocation5 + $0x30] sm:$0xff] %vm172_vm12, %v164_v40  ;;  %vm326_vm12 = vcmask 806648  }
  0xac   :  { %183 = vst.msk [vmem:[#allocation5 + $0x30] sm:$0xff] %vm179_vm13, %v670_v11  ;;  %vm358_vm13 = vcmask 814872  }
  0xad   :  { %215 = vst.msk [vmem:[#allocation5 + $0x30] sm:$0xff] %vm211_vm14, %v203_v34 }
  0xae   :  { %185 = vst.msk [vmem:[#allocation5 + $0x40] sm:$0xf] %vm184_vm0, %v670_v11  ;;  %vm424_vm0 = vcmask 982968  }
  0xaf   :  { %495 = vrot.lane.b32.xlu1 %v481_v42, %s673_s17  ;;  %493 = vrot.lane.b32.xlu0 %v697_v3, %s673_s17 }
  0xb0   :  { %519 = vrot.lane.b32.xlu2 %v693_v1, %s673_s17 }
  0xb1   :  { %v201_v43 = vpop.permute.xlu1 %200  ;;  %v199_v44 = vpop.permute.xlu0 %198 }
  0xb2   :  { %214 = vst.msk [vmem:[#allocation5 + $0x20] sm:$0xff] %vm211_vm14, %v201_v43  ;;  %v272_v45 = vpop.permute.xlu2 %271 }
  0xb3   :  { %213 = vst.msk [vmem:[#allocation5 + $0x10] sm:$0xff] %vm211_vm14, %v199_v44  ;;  %vm385_vm14 = vcmask 941856  }
  0xb4   :  { %245 = vst.msk [vmem:[#allocation5 + $0x10] sm:$0xff] %vm243_vm1, %v231_v38 }
  0xb5   :  { %252 = vst.msk [vmem:[#allocation5 + $0x10] sm:$0xff] %vm250_vm2, %v670_v11 }
  0xb7   :  { %523 = vrot.lane.b32.xlu1 %v691_v0, %s673_s17  ;;  %521 = vrot.lane.b32.xlu0 %v699_v4, %s673_s17 }
  0xb8   :  { %525 = vrot.lane.b32.xlu2 %v697_v3, %s673_s17 }
  0xb9   :  { %v229_v46 = vpop.permute.xlu1 %228  ;;  %v205_v47 = vpop.permute.xlu0 %204 }
  0xba   :  { %244 = vst.msk [vmem:[#allocation5] sm:$0xff] %vm243_vm1, %v229_v46  ;;  %v300_v48 = vpop.permute.xlu2 %299 }
  0xbb   :  { %217 = vst.msk [vmem:[#allocation5 + $0x40] sm:$0xf] %vm216_vm3, %v205_v47  ;;  %vm390_vm3 = vcmask 937760  }
  0xbc   :  { %249 = vst.msk [vmem:[#allocation5 + $0x40] sm:$0xf] %vm248_vm4, %v237_v41  ;;  %vm397_vm4 = vcmask 970648  }
  0xbd   :  { %251 = vst.msk [vmem:[#allocation5] sm:$0xff] %vm250_vm2, %v670_v11 }
  0xbe   :  { %256 = vst.msk [vmem:[#allocation5 + $0x40] sm:$0xf] %vm255_vm5, %v670_v11  ;;  %vm468_vm5 = vcmask 52224  }
  0xbf   :  { %558 = vrot.lane.b32.xlu1 %v693_v1, %s674_s18  ;;  %527 = vrot.lane.b32.xlu0 %v513_v49, %s673_s17 }
  0xc0   :  { %560 = vrot.lane.b32.xlu2 %v699_v4, %s674_s18 }
  0xc1   :  { %v235_v50 = vpop.permute.xlu1 %234  ;;  %v233_v51 = vpop.permute.xlu0 %232 }
  0xc2   :  { %247 = vst.msk [vmem:[#allocation5 + $0x30] sm:$0xff] %vm243_vm1, %v235_v50  ;;  %v306_v52 = vpop.permute.xlu2 %305 }
  0xc3   :  { %246 = vst.msk [vmem:[#allocation5 + $0x20] sm:$0xff] %vm243_vm1, %v233_v51  ;;  %vm458_vm1 = vcmask 56320  }
  0xc4   :  { %253 = vst.msk [vmem:[#allocation5 + $0x20] sm:$0xff] %vm250_vm2, %v670_v11 }
  0xc5   :  { %285 = vst.msk [vmem:[#allocation5 + $0x20] sm:$0xff] %vm282_vm6, %v272_v45 }
  0xc6   :  { %254 = vst.msk [vmem:[#allocation5 + $0x30] sm:$0xff] %vm250_vm2, %v670_v11  ;;  %vm470_vm2 = vcmask 89144  }
  0xc7   :  { %564 = vrot.lane.b32.xlu1 %v697_v3, %s674_s18  ;;  %562 = vrot.lane.b32.xlu0 %v691_v0, %s674_s18 }
  0xc8   :  { %566 = vrot.lane.b32.xlu2 %v552_v53, %s674_s18 }
  0xc9   :  { %v270_v54 = vpop.permute.xlu1 %269  ;;  %v268_v55 = vpop.permute.xlu0 %267 }
  0xca   :  { %284 = vst.msk [vmem:[#allocation5 + $0x10] sm:$0xff] %vm282_vm6, %v270_v54  ;;  %v341_v56 = vpop.permute.xlu2 %340 }
  0xcb   :  { %283 = vst.msk [vmem:[#allocation5] sm:$0xff] %vm282_vm6, %v268_v55 }
  0xcc   :  { %315 = vst.msk [vmem:[#allocation5] sm:$0xff] %vm314_vm7, %v300_v48 }
  0xcd   :  { %322 = vst.msk [vmem:[#allocation5] sm:$0xff] %vm321_vm8, %v670_v11 }
  0xd1   :  { %v276_v57 = vpop.permute.xlu1 %275  ;;  %v274_v58 = vpop.permute.xlu0 %273 }
  0xd2   :  { %288 = vst.msk [vmem:[#allocation5 + $0x40] sm:$0xf] %vm287_vm9, %v276_v57  ;;  %v347_v59 = vpop.permute.xlu2 %346  ;;  %vm466_vm9 = vcmask 1044416  }
  0xd3   :  { %286 = vst.msk [vmem:[#allocation5 + $0x30] sm:$0xff] %vm282_vm6, %v274_v58  ;;  %vm475_vm6 = vcmask 85048  }
  0xd4   :  { %318 = vst.msk [vmem:[#allocation5 + $0x30] sm:$0xff] %vm314_vm7, %v306_v52 }
  0xd5   :  { %325 = vst.msk [vmem:[#allocation5 + $0x30] sm:$0xff] %vm321_vm8, %v670_v11 }
  0xd9   :  { %v304_v60 = vpop.permute.xlu1 %303  ;;  %v302_v61 = vpop.permute.xlu0 %301 }
  0xda   :  { %317 = vst.msk [vmem:[#allocation5 + $0x20] sm:$0xff] %vm314_vm7, %v304_v60  ;;  %v375_v62 = vpop.permute.xlu2 %374 }
  0xdb   :  { %316 = vst.msk [vmem:[#allocation5 + $0x10] sm:$0xff] %vm314_vm7, %v302_v61  ;;  %vm456_vm7 = vcmask 1048512  }
  0xdc   :  { %323 = vst.msk [vmem:[#allocation5 + $0x10] sm:$0xff] %vm321_vm8, %v670_v11 }
  0xdd   :  { %355 = vst.msk [vmem:[#allocation5 + $0x10] sm:$0xff] %vm353_vm10, %v341_v56 }
  0xde   :  { %324 = vst.msk [vmem:[#allocation5 + $0x20] sm:$0xff] %vm321_vm8, %v670_v11  ;;  %vm429_vm8 = vcmask 978872  }
  0xe1   :  { %v339_v63 = vpop.permute.xlu1 %338  ;;  %v308_v0 = vpop.permute.xlu0 %307 }
  0xe2   :  { %354 = vst.msk [vmem:[#allocation5] sm:$0xff] %vm353_vm10, %v339_v63  ;;  %v410_v1 = vpop.permute.xlu2 %409 }
  0xe3   :  { %320 = vst.msk [vmem:[#allocation5 + $0x40] sm:$0xf] %vm319_vm11, %v308_v0  ;;  %vm534_vm11 = vcmask 220256  }
  0xe4   :  { %327 = vst.msk [vmem:[#allocation5 + $0x40] sm:$0xf] %vm326_vm12, %v670_v11  ;;  %vm541_vm12 = vcmask 253144  }
  0xe5   :  { %359 = vst.msk [vmem:[#allocation5 + $0x40] sm:$0xf] %vm358_vm13, %v347_v59  ;;  %vm507_vm13 = vcmask 93272  }
  0xe9   :  { %v345_v2 = vpop.permute.xlu1 %344  ;;  %v343_v3 = vpop.permute.xlu0 %342 }
  0xea   :  { %357 = vst.msk [vmem:[#allocation5 + $0x30] sm:$0xff] %vm353_vm10, %v345_v2  ;;  %v416_v4 = vpop.permute.xlu2 %415 }
  0xeb   :  { %356 = vst.msk [vmem:[#allocation5 + $0x20] sm:$0xff] %vm353_vm10, %v343_v3  ;;  %vm502_vm10 = vcmask 97368  }
  0xec   :  { %388 = vst.msk [vmem:[#allocation5 + $0x20] sm:$0xff] %vm385_vm14, %v375_v62 }
  0xed   :  { %395 = vst.msk [vmem:[#allocation5 + $0x20] sm:$0xff] %vm392_vm15, %v670_v11 }
  0xf1   :  { %v373_v5 = vpop.permute.xlu1 %372  ;;  %v371_v6 = vpop.permute.xlu0 %370 }
  0xf2   :  { %387 = vst.msk [vmem:[#allocation5 + $0x10] sm:$0xff] %vm385_vm14, %v373_v5  ;;  %v444_v7 = vpop.permute.xlu2 %443 }
  0xf3   :  { %386 = vst.msk [vmem:[#allocation5] sm:$0xff] %vm385_vm14, %v371_v6 }
  0xf4   :  { %393 = vst.msk [vmem:[#allocation5] sm:$0xff] %vm392_vm15, %v670_v11 }
  0xf5   :  { %425 = vst.msk [vmem:[#allocation5] sm:$0xff] %vm424_vm0, %v410_v1 }
  0xf6   :  { %394 = vst.msk [vmem:[#allocation5 + $0x10] sm:$0xff] %vm392_vm15, %v670_v11 }
  0xf7   :  { %461 = vst.msk [vmem:[#allocation5 + $0x18] sm:$0xff] %vm458_vm1, %v444_v7 }
  0xf8   :  { %472 = vst.msk [vmem:[#allocation5 + $0x18] sm:$0xff] %vm470_vm2, %v670_v11 }
  0xf9   :  { %v379_v8 = vpop.permute.xlu1 %378  ;;  %v377_v9 = vpop.permute.xlu0 %376 }
  0xfa   :  { %391 = vst.msk [vmem:[#allocation5 + $0x40] sm:$0xf] %vm390_vm3, %v379_v8  ;;  %v450_v10 = vpop.permute.xlu2 %449 }
  0xfb   :  { %389 = vst.msk [vmem:[#allocation5 + $0x30] sm:$0xff] %vm385_vm14, %v377_v9  ;;  %vm573_vm14 = vcmask 261368  }
  0xfc   :  { %396 = vst.msk [vmem:[#allocation5 + $0x30] sm:$0xff] %vm392_vm15, %v670_v11  ;;  %vm539_vm15 = vcmask 216160  }
  0xfd   :  { %428 = vst.msk [vmem:[#allocation5 + $0x30] sm:$0xff] %vm424_vm0, %v416_v4 }
  0xfe   :  { %398 = vst.msk [vmem:[#allocation5 + $0x40] sm:$0xf] %vm397_vm4, %v670_v11 }
  0xff   :  { %469 = vst.msk [vmem:[#allocation5 + $0x48] sm:$0xf] %vm468_vm5, %v450_v10 }
 0x100   :  { %476 = vst.msk [vmem:[#allocation5 + $0x48] sm:$0xf] %vm475_vm6, %v670_v11 }
 0x101   :  { %v414_v12 = vpop.permute.xlu1 %413  ;;  %v412_v13 = vpop.permute.xlu0 %411 }
 0x102   :  { %427 = vst.msk [vmem:[#allocation5 + $0x20] sm:$0xff] %vm424_vm0, %v414_v12  ;;  %v492_v16 = vpop.permute.xlu2 %491 }
 0x103   :  { %426 = vst.msk [vmem:[#allocation5 + $0x10] sm:$0xff] %vm424_vm0, %v412_v13  ;;  %vm546_vm0 = vcmask 249048  }
 0x104   :  { %460 = vst.msk [vmem:[#allocation5 + $0x10] sm:$0xff] %vm456_vm7, %v444_v7 }
 0x109   :  { %v442_v14 = vpop.permute.xlu1 %441  ;;  %v418_v15 = vpop.permute.xlu0 %417 }
 0x10a   :  { %457 = vst.msk [vmem:[#allocation5] sm:$0xff] %vm456_vm7, %v442_v14  ;;  %v520_v19 = vpop.permute.xlu2 %519 }
 0x10b   :  { %459 = vst.msk [vmem:[#allocation5 + $0x8] sm:$0xff] %vm458_vm1, %v442_v14 }
 0x10c   :  { %471 = vst.msk [vmem:[#allocation5 + $0x8] sm:$0xff] %vm470_vm2, %v670_v11 }
 0x10d   :  { %430 = vst.msk [vmem:[#allocation5 + $0x40] sm:$0xf] %vm429_vm8, %v418_v15 }
 0x10e   :  { %467 = vst.msk [vmem:[#allocation5 + $0x40] sm:$0xf] %vm466_vm9, %v450_v10 }
 0x111   :  { %v448_v17 = vpop.permute.xlu1 %447  ;;  %v446_v18 = vpop.permute.xlu0 %445 }
 0x112   :  { %464 = vst.msk [vmem:[#allocation5 + $0x30] sm:$0xff] %vm456_vm7, %v448_v17  ;;  %v526_v22 = vpop.permute.xlu2 %525 }
 0x113   :  { %465 = vst.msk [vmem:[#allocation5 + $0x38] sm:$0xff] %vm458_vm1, %v448_v17 }
 0x114   :  { %474 = vst.msk [vmem:[#allocation5 + $0x38] sm:$0xff] %vm470_vm2, %v670_v11 }
 0x115   :  { %462 = vst.msk [vmem:[#allocation5 + $0x20] sm:$0xff] %vm456_vm7, %v446_v18 }
 0x116   :  { %463 = vst.msk [vmem:[#allocation5 + $0x28] sm:$0xff] %vm458_vm1, %v446_v18  ;;  %vm578_vm1 = vcmask 257272  }
 0x117   :  { %473 = vst.msk [vmem:[#allocation5 + $0x28] sm:$0xff] %vm470_vm2, %v670_v11 }
 0x118   :  { %505 = vst.msk [vmem:[#allocation5 + $0x28] sm:$0xff] %vm502_vm10, %v492_v16 }
 0x119   :  { %v490_v20 = vpop.permute.xlu1 %489  ;;  %v488_v21 = vpop.permute.xlu0 %487 }
 0x11a   :  { %504 = vst.msk [vmem:[#allocation5 + $0x18] sm:$0xff] %vm502_vm10, %v490_v20  ;;  %v561_v25 = vpop.permute.xlu2 %560 }
 0x11b   :  { %503 = vst.msk [vmem:[#allocation5 + $0x8] sm:$0xff] %vm502_vm10, %v488_v21 }
 0x11c   :  { %535 = vst.msk [vmem:[#allocation5 + $0x8] sm:$0xff] %vm534_vm11, %v520_v19 }
 0x11d   :  { %542 = vst.msk [vmem:[#allocation5 + $0x8] sm:$0xff] %vm541_vm12, %v670_v11 }
 0x121   :  { %v496_v23 = vpop.permute.xlu1 %495  ;;  %v494_v24 = vpop.permute.xlu0 %493 }
 0x122   :  { %508 = vst.msk [vmem:[#allocation5 + $0x48] sm:$0xf] %vm507_vm13, %v496_v23  ;;  %v567_v30 = vpop.permute.xlu2 %566 }
 0x123   :  { %506 = vst.msk [vmem:[#allocation5 + $0x38] sm:$0xff] %vm502_vm10, %v494_v24 }
 0x124   :  { %538 = vst.msk [vmem:[#allocation5 + $0x38] sm:$0xff] %vm534_vm11, %v526_v22 }
 0x125   :  { %545 = vst.msk [vmem:[#allocation5 + $0x38] sm:$0xff] %vm541_vm12, %v670_v11 }
 0x129   :  { %v524_v26 = vpop.permute.xlu1 %523  ;;  %v522_v27 = vpop.permute.xlu0 %521 }
 0x12a   :  { %537 = vst.msk [vmem:[#allocation5 + $0x28] sm:$0xff] %vm534_vm11, %v524_v26 }
 0x12b   :  { %536 = vst.msk [vmem:[#allocation5 + $0x18] sm:$0xff] %vm534_vm11, %v522_v27 }
 0x12c   :  { %543 = vst.msk [vmem:[#allocation5 + $0x18] sm:$0xff] %vm541_vm12, %v670_v11 }
 0x12d   :  { %575 = vst.msk [vmem:[#allocation5 + $0x18] sm:$0xff] %vm573_vm14, %v561_v25 }
 0x12e   :  { %544 = vst.msk [vmem:[#allocation5 + $0x28] sm:$0xff] %vm541_vm12, %v670_v11 }
 0x131   :  { %v559_v28 = vpop.permute.xlu1 %558  ;;  %v528_v29 = vpop.permute.xlu0 %527 }
 0x132   :  { %574 = vst.msk [vmem:[#allocation5 + $0x8] sm:$0xff] %vm573_vm14, %v559_v28 }
 0x133   :  { %540 = vst.msk [vmem:[#allocation5 + $0x48] sm:$0xf] %vm539_vm15, %v528_v29 }
 0x134   :  { %547 = vst.msk [vmem:[#allocation5 + $0x48] sm:$0xf] %vm546_vm0, %v670_v11 }
 0x135   :  { %579 = vst.msk [vmem:[#allocation5 + $0x48] sm:$0xf] %vm578_vm1, %v567_v30 }
 0x139   :  { %v565_v31 = vpop.permute.xlu1 %564  ;;  %v563_v32 = vpop.permute.xlu0 %562 }
 0x13a   :  { %577 = vst.msk [vmem:[#allocation5 + $0x38] sm:$0xff] %vm573_vm14, %v565_v31 }
 0x13b   :  { %576 = vst.msk [vmem:[#allocation5 + $0x28] sm:$0xff] %vm573_vm14, %v563_v32 }
 0x13c   :  { %592 = dma.vmem_to_hbm [thread:$0]  %s585_s23, 1280, %s587_s21, [#allocation4], %s676_s24, %s676_s24, %s669_s14  }
 0x13d   :  { %662 = dma.done.wait [#allocation4], 1280  }
 0x13e   :  { %663 = vsyncadd [#allocation4], 4294966016 }
 0x13f   :  { %597 = vsyncpa [#allocation3], 1 }
 0x140   :  { %598 = vsyncpa [#allocation4], 1 }

</bundles_post_ra>
